<compile_context>
chip_gen: v7x
topology: tpu7x:2x2x1
jax: 0.10.0
libtpu: 0.0.40
codegen_flags: <defaults>
</compile_context>

<pallas_src>
import functools

import jax
import jax.numpy as jnp
from jax.experimental import pallas as pl
from jax.experimental.pallas import tpu as pltpu


def _round_up(n, m):
    return ((n + m - 1) // m) * m


# ----------------------------------------------------------------------------
# Kernel body
# ----------------------------------------------------------------------------
def gated_residual_kernel(x_ref, wg1_ref, bg1_ref, w2_ref, b2_ref, o_ref, *, dp):
    x = x_ref[...]                               # [tm, Dp], caller dtype
    x_f32 = x.astype(jnp.float32)                # residual path stays f32
    x_bf = x.astype(jnp.bfloat16)                # bf16 feed for the MXU

    # Fused first stage: one MXU pass for [gate_lin || h_lin] = x @ [Wg || W1].
    gh = jnp.dot(x_bf, wg1_ref[...], preferred_element_type=jnp.float32) + bg1_ref[...]
    gate = jax.nn.sigmoid(gh[:, :dp])            # EUP, f32
    h = jnp.maximum(gh[:, dp:], 0.0).astype(jnp.bfloat16)

    # Second stage: res = relu(...) @ W2 + b2   (f32 accumulation)
    res = jnp.dot(h, w2_ref[...], preferred_element_type=jnp.float32) + b2_ref[...]

    o_ref[...] = (x_f32 + gate * res).astype(o_ref.dtype)


# ----------------------------------------------------------------------------
# One-time hardware probe / VMEM accounting / tile selection
# ----------------------------------------------------------------------------
@functools.lru_cache(maxsize=1)
def _vmem_capacity_bytes():
    # One-time capability probe (NOT a per-call try/except around the kernel).
    try:
        cap = int(getattr(pltpu.get_tpu_info(), "vmem_capacity_bytes"))
        if cap > 0:
            return cap
    except Exception:
        pass
    return 64 << 20  # conservative default: v7x per-TensorCore VMEM


def _vmem_needed(tm, dp, in_bytes, out_bytes):
    return (
        2 * tm * dp * in_bytes            # x tile, double-buffered
        + 2 * tm * dp * out_bytes         # out tile, double-buffered
        + 2 * (2 * dp * dp * 2)           # fused [Dp, 2Dp] bf16 Wg||W1 (2 bufs)
        + 2 * (dp * dp * 2)               # [Dp, Dp] bf16 W2 (2 bufs)
        + 2 * (8 * 2 * dp + 8 * dp) * 4   # f32 biases padded to 8 sublanes (2 bufs)
        + 24 * tm * dp                    # live in-kernel intermediates (gh, gate, h, res, x_f32)
    )


def _choose_tm(n, dp, vmem_cap, io_itemsize):
    """Pick tm from {512, 256, 128}: min padding waste, prefer >=2 grid steps
    (both v7x TensorCores), then prefer the largest tile (v5e/v6e amortization),
    subject to a VMEM budget."""
    budget = int(0.6 * vmem_cap)
    best_key, best = None, None
    for tm in (512, 256, 128):
        if tm != 128 and _vmem_needed(tm, dp, io_itemsize, io_itemsize) > budget:
            continue
        np_pad = _round_up(max(n, 1), tm)
        steps = np_pad // tm
        key = (np_pad - n, 0 if steps >= 2 else 1, -tm)
        if best_key is None or key < best_key:
            best_key, best = key, (tm, np_pad)
    return best


# ----------------------------------------------------------------------------
# pallas_call builder (cached per shape/dtype; built once, reused every call)
# ----------------------------------------------------------------------------
@functools.lru_cache(maxsize=None)
def _build_call(Np, Dp, tm, io_dtype_name):
    io_dtype = jnp.dtype(io_dtype_name)
    nbytes = io_dtype.itemsize

    cap = _vmem_capacity_bytes()
    needed = _vmem_needed(tm, Dp, nbytes, nbytes)
    vmem_limit = int(min(max(needed + (8 << 20), 32 << 20), int(0.85 * cap)))

    cost = pl.CostEstimate(
        flops=6 * Np * Dp * Dp,                                  # three DxD matmuls
        transcendentals=Np * Dp,                                 # sigmoid
        bytes_accessed=2 * Np * Dp * nbytes + 3 * Dp * Dp * 2 + 3 * Dp * 4,
    )

    kernel = functools.partial(gated_residual_kernel, dp=Dp)

    return pl.pallas_call(
        kernel,
        out_shape=jax.ShapeDtypeStruct((Np, Dp), io_dtype),
        grid_spec=pltpu.PrefetchScalarGridSpec(
            num_scalar_prefetch=0,
            grid=(Np // tm,),
            in_specs=[
                pl.BlockSpec((tm, Dp), lambda i: (i, 0)),        # x tile (streamed)
                pl.BlockSpec((Dp, 2 * Dp), lambda i: (0, 0)),    # fused Wg||W1 (resident)
                pl.BlockSpec((1, 2 * Dp), lambda i: (0, 0)),     # fused bg||b1
                pl.BlockSpec((Dp, Dp), lambda i: (0, 0)),        # W2 (resident)
                pl.BlockSpec((1, Dp), lambda i: (0, 0)),         # b2
            ],
            out_specs=pl.BlockSpec((tm, Dp), lambda i: (i, 0)),
        ),
        compiler_params=pltpu.CompilerParams(
            dimension_semantics=("parallel",),
            vmem_limit_bytes=vmem_limit,
        ),
        cost_estimate=cost,
    )


# ----------------------------------------------------------------------------
# Public API
# ----------------------------------------------------------------------------
def prepare_gated_residual_params(wg, bg, w1, b1, w2, b2):
    """One-time weight packing (weight-stationary): bf16-cast, 128-pad, and
    fuse Wg/W1 into one [Dp, 2*Dp] matrix. Weights are [D_in, D_out]
    (PyTorch nn.Linear weights pre-transposed); biases are [D] or [1, D]."""
    D = wg.shape[0]
    Dp = _round_up(D, 128)

    def pad_w(w):
        return jnp.pad(jnp.asarray(w, jnp.float32).astype(jnp.bfloat16),
                       ((0, Dp - D), (0, Dp - D)))

    def pad_b(b):
        b = jnp.asarray(b, jnp.float32).reshape(1, -1)
        return jnp.pad(b, ((0, 0), (0, Dp - b.shape[1])))

    return {
        "wg1": jnp.concatenate([pad_w(wg), pad_w(w1)], axis=1),  # [Dp, 2Dp] bf16
        "bg1": jnp.concatenate([pad_b(bg), pad_b(b1)], axis=1),  # [1, 2Dp] f32
        "w2": pad_w(w2),                                          # [Dp, Dp]  bf16
        "b2": pad_b(b2),                                          # [1, Dp]   f32
    }


def _gated_residual_apply(x, params):
    """x: [N, D] (f32 or bf16). Output matches x.dtype."""
    N, D = x.shape
    Dp = params["wg1"].shape[0]
    itemsize = jnp.dtype(x.dtype).itemsize
    tm, Np = _choose_tm(N, Dp, _vmem_capacity_bytes(), itemsize)

    x_p = jnp.pad(x, ((0, Np - N), (0, Dp - D)))
    call = _build_call(Np, Dp, tm, jnp.dtype(x.dtype).name)
    out_p = call(x_p, params["wg1"], params["bg1"], params["w2"], params["b2"])
    return out_p[:N, :D]


gated_residual_apply = jax.jit(_gated_residual_apply)


def gated_residual_ref(x, wg, bg, w1, b1, w2, b2):
    bg = jnp.asarray(bg).reshape(1, -1)
    b1 = jnp.asarray(b1).reshape(1, -1)
    b2 = jnp.asarray(b2).reshape(1, -1)
    gate = jax.nn.sigmoid(x @ wg + bg)
    res = jnp.maximum(x @ w1 + b1, 0.0) @ w2 + b2
    return x + gate * res


def gated_residual(x, wg, bg, w1, b1, w2, b2):
    """Convenience one-shot entry. For weight-stationary loops, call
    prepare_gated_residual_params once and gated_residual_apply per step."""
    N, D = x.shape
    if N * D < 128 * 128:
        # Tiny problems: padding to one 128x128 MXU tile is mostly waste and
        # the Pallas launch overhead dominates -> plain XLA is faster.
        return gated_residual_ref(x, wg, bg, w1, b1, w2, b2)
    return gated_residual_apply(x, prepare_gated_residual_params(wg, bg, w1, b1, w2, b2))


# ----------------------------------------------------------------------------
# Self-test
# ----------------------------------------------------------------------------
if __name__ == "__main__":
    dim = 128               # feature dim (DPVO uses D=384; 128 keeps the test small)
    batch, seq = 2, 128     # 256 tokens -> 2 grid steps of tm=128

    key = jax.random.PRNGKey(0)
    kx, kwg, kbg, kw1, kb1, kw2, kb2 = jax.random.split(key, 7)

    x = jax.random.normal(kx, (batch, seq, dim), dtype=jnp.float32)

    # Deterministic synthetic parameters (nn.Linear(dim, dim) shapes, W pre-transposed).
    scale = 1.0 / (dim ** 0.5)
    wg = jax.random.uniform(kwg, (dim, dim), jnp.float32, -scale, scale)
    bg = jax.random.uniform(kbg, (1, dim), jnp.float32, -scale, scale)
    w1 = jax.random.uniform(kw1, (dim, dim), jnp.float32, -scale, scale)
    b1 = jax.random.uniform(kb1, (1, dim), jnp.float32, -scale, scale)
    w2 = jax.random.uniform(kw2, (dim, dim), jnp.float32, -scale, scale)
    b2 = jax.random.uniform(kb2, (1, dim), jnp.float32, -scale, scale)

    x_flat = x.reshape(batch * seq, dim)

    # Weight-stationary usage: pack once, apply many times (here: once).
    params = prepare_gated_residual_params(wg, bg, w1, b1, w2, b2)
    out = gated_residual_apply(x_flat, params)
    out = jax.block_until_ready(out).reshape(batch, seq, dim)

    ref = gated_residual_ref(x_flat, wg, bg, w1, b1, w2, b2).reshape(batch, seq, dim)

    assert out.shape == x.shape
    max_err = float(jnp.max(jnp.abs(out - ref)))
    # bf16 MXU inputs with f32 accumulation -> slightly looser tolerance than pure f32.
    assert jnp.allclose(out, ref, atol=2e-2, rtol=2e-2), f"max abs err {max_err}"

    print("KERNEL_OK")
</pallas_src>

<mosaic_0001>
module attributes {stable_mosaic.version = 11 : i64} {
  func.func @gated_residual_kernel(%arg0: i32, %arg1: memref<128x128xf32, #tpu.memory_space<vmem>>, %arg2: memref<128x256xbf16, #tpu.memory_space<vmem>>, %arg3: memref<1x256xf32, #tpu.memory_space<vmem>>, %arg4: memref<128x128xbf16, #tpu.memory_space<vmem>>, %arg5: memref<1x128xf32, #tpu.memory_space<vmem>>, %arg6: memref<128x128xf32, #tpu.memory_space<vmem>>) attributes {dimension_semantics = [#tpu.dimension_semantics<parallel>], iteration_bounds = array<i64: 2>, scalar_prefetch = 0 : i64, scratch_operands = 0 : i64, tpu.core_type = #tpu.core_type<tc>, window_params = [{transform_indices = @transform_0, window_bounds = array<i64: 128, 128>}, {pipeline_mode = #tpu.pipeline_mode<synchronous>, transform_indices = @transform_1, window_bounds = array<i64: 128, 256>}, {pipeline_mode = #tpu.pipeline_mode<synchronous>, transform_indices = @transform_2, window_bounds = array<i64: 1, 256>}, {pipeline_mode = #tpu.pipeline_mode<synchronous>, transform_indices = @transform_3, window_bounds = array<i64: 128, 128>}, {pipeline_mode = #tpu.pipeline_mode<synchronous>, transform_indices = @transform_4, window_bounds = array<i64: 1, 128>}, {transform_indices = @transform_5, window_bounds = array<i64: 128, 128>}]} {
    %c0 = arith.constant 0 : index
    %c0_0 = arith.constant 0 : index
    %0 = vector.load %arg1[%c0, %c0_0] : memref<128x128xf32, #tpu.memory_space<vmem>>, vector<128x128xf32>
    %1 = arith.truncf %0 : vector<128x128xf32> to vector<128x128xbf16>
    %c0_1 = arith.constant 0 : index
    %c0_2 = arith.constant 0 : index
    %2 = vector.load %arg2[%c0_1, %c0_2] : memref<128x256xbf16, #tpu.memory_space<vmem>>, vector<128x256xbf16>
    %cst = arith.constant dense<0.000000e+00> : vector<128x256xf32>
    %3 = tpu.matmul %1, %2, %cst {dimension_numbers = #tpu.dot_dimension_numbers<[1], [0], [0], [1], [0, 0, 1, 1], [], []>} : vector<128x128xbf16>, vector<128x256xbf16>, vector<128x256xf32> -> vector<128x256xf32>
    %c0_3 = arith.constant 0 : index
    %c0_4 = arith.constant 0 : index
    %4 = vector.load %arg3[%c0_3, %c0_4] : memref<1x256xf32, #tpu.memory_space<vmem>>, vector<1x256xf32>
    %5 = vector.broadcast %4 : vector<1x256xf32> to vector<128x256xf32>
    %6 = arith.addf %3, %5 : vector<128x256xf32>
    %7 = vector.extract_strided_slice %6 {offsets = [0, 0], sizes = [128, 128], strides = [1, 1]} : vector<128x256xf32> to vector<128x128xf32>
    %8 = arith.negf %7 : vector<128x128xf32>
    %9 = math.exp %8 : vector<128x128xf32>
    %cst_5 = arith.constant 1.000000e+00 : f32
    %10 = vector.broadcast %cst_5 : f32 to vector<128x128xf32>
    %11 = arith.addf %10, %9 : vector<128x128xf32>
    %12 = arith.divf %10, %11 : vector<128x128xf32>
    %13 = vector.extract_strided_slice %6 {offsets = [0, 128], sizes = [128, 128], strides = [1, 1]} : vector<128x256xf32> to vector<128x128xf32>
    %cst_6 = arith.constant 0.000000e+00 : f32
    %14 = vector.broadcast %cst_6 : f32 to vector<128x128xf32>
    %15 = arith.maximumf %13, %14 : vector<128x128xf32>
    %16 = arith.truncf %15 : vector<128x128xf32> to vector<128x128xbf16>
    %c0_7 = arith.constant 0 : index
    %c0_8 = arith.constant 0 : index
    %17 = vector.load %arg4[%c0_7, %c0_8] : memref<128x128xbf16, #tpu.memory_space<vmem>>, vector<128x128xbf16>
    %cst_9 = arith.constant dense<0.000000e+00> : vector<128x128xf32>
    %18 = tpu.matmul %16, %17, %cst_9 {dimension_numbers = #tpu.dot_dimension_numbers<[1], [0], [0], [1], [0, 0, 1, 1], [], []>} : vector<128x128xbf16>, vector<128x128xbf16>, vector<128x128xf32> -> vector<128x128xf32>
    %c0_10 = arith.constant 0 : index
    %c0_11 = arith.constant 0 : index
    %19 = vector.load %arg5[%c0_10, %c0_11] : memref<1x128xf32, #tpu.memory_space<vmem>>, vector<1x128xf32>
    %20 = vector.broadcast %19 : vector<1x128xf32> to vector<128x128xf32>
    %21 = arith.addf %18, %20 : vector<128x128xf32>
    %22 = arith.mulf %12, %21 : vector<128x128xf32>
    %23 = arith.addf %0, %22 : vector<128x128xf32>
    %c0_12 = arith.constant 0 : index
    %c0_13 = arith.constant 0 : index
    %24 = vector.load %arg6[%c0_12, %c0_13] : memref<128x128xf32, #tpu.memory_space<vmem>>, vector<128x128xf32>
    tpu.vector_store %arg6[%c0_12, %c0_13], %23 {strides = array<i32>} : memref<128x128xf32, #tpu.memory_space<vmem>>, vector<128x128xf32>,
    return
  }
  func.func @transform_0(%arg0: i32) -> (i32, i32) {
    %c0_i32 = arith.constant 0 : i32
    %c0_i32_0 = arith.constant 0 : i32
    return %arg0, %c0_i32 : i32, i32
  }
  func.func @transform_1(%arg0: i32) -> (i32, i32) {
    %c0_i32 = arith.constant 0 : i32
    %c0_i32_0 = arith.constant 0 : i32
    %c0_i32_1 = arith.constant 0 : i32
    return %c0_i32, %c0_i32_0 : i32, i32
  }
  func.func @transform_2(%arg0: i32) -> (i32, i32) {
    %c0_i32 = arith.constant 0 : i32
    %c0_i32_0 = arith.constant 0 : i32
    %c0_i32_1 = arith.constant 0 : i32
    return %c0_i32, %c0_i32_0 : i32, i32
  }
  func.func @transform_3(%arg0: i32) -> (i32, i32) {
    %c0_i32 = arith.constant 0 : i32
    %c0_i32_0 = arith.constant 0 : i32
    %c0_i32_1 = arith.constant 0 : i32
    return %c0_i32, %c0_i32_0 : i32, i32
  }
  func.func @transform_4(%arg0: i32) -> (i32, i32) {
    %c0_i32 = arith.constant 0 : i32
    %c0_i32_0 = arith.constant 0 : i32
    %c0_i32_1 = arith.constant 0 : i32
    return %c0_i32, %c0_i32_0 : i32, i32
  }
  func.func @transform_5(%arg0: i32) -> (i32, i32) {
    %c0_i32 = arith.constant 0 : i32
    %c0_i32_0 = arith.constant 0 : i32
    return %arg0, %c0_i32 : i32, i32
  }
}

</mosaic_0001>

<bundles_post_ra>
// kernel: _gated_residual_apply.1
= control target key start
LH: loop header
LB: loop body
LE: loop exit
PB: predicated region body
PF: predicated region fallthrough
CT: control target
= control target key end

     0   :  { %10 = vsyncpa [#allocation3], 0  ;;  %s1909_s0 = inlined_call_operand.hbm [shape: f32[256,128], index: 0, kind: input, shape index: {}]   ;;  %s1910_s1 = inlined_call_operand.hbm [shape: bf16[128,256], index: 1, kind: input, shape index: {}]   ;;  %s1911_s2 = inlined_call_operand.vmem [shape: f32[1,256], index: 2, kind: input, shape index: {}]   ;;  %s1912_s3 = inlined_call_operand.hbm [shape: bf16[128,128], index: 3, kind: input, shape index: {}]   ;;  %s1913_s4 = inlined_call_operand.vmem [shape: f32[1,128], index: 4, kind: input, shape index: {}]   ;;  %s1914_s5 = inlined_call_operand.hbm [shape: f32[256,128], index: 5, kind: output, shape index: {}]  }
   0x1   :  { %12 = vsyncpa [#allocation3 + $0x1], 0 }
   0x2   :  { %13 = vsyncpa [#allocation6], 0 }
   0x3   :  { %14 = vsyncpa [#allocation4], 0 }
   0x4   :  { %16 = vsyncpa [#allocation4 + $0x1], 0  ;;  %s1440_s18 = smov 0   ;;  %s1442_s19 = smov 0  }
   0x5   :  { %s1444_s20 = smov 0   ;;  %s1446_s21 = smov 0  }
   0x6 LB: > { %s1461_s22 = sadd.s32 4294967295, %s1397_s21   ;;  %s962_s23 = sadd.s32 4294967294, %s1397_s21   ;;  %s1397_s21 = sphi %s1446_s21, %s1934_s21   ;;  %s1393_s20 = sphi %s1444_s20, %s1933_s20   ;;  %s1389_s19 = sphi %s1442_s19, %s1932_s19   ;;  %s1385_s18 = sphi %s1440_s18, %s1931_s18  }
   0x7   : > { %p42_p0 = scmp.ne.s32.totalorder %s1389_s19, %s1385_s18  ;;  %p1915_p1 = scmp.eq.s32.totalorder %s1461_s22, 0 }
   0x8   : > { %p156_p3 = scmp.eq.s32.totalorder %s962_s23, 1  ;;  %p963_p5 = scmp.ge.s32.totalorder %s1397_s21, 1 }
   0x9   : > { %p1470_p4 = por %p1915_p1, %p42_p0  ;;  %p163_p7 = scmp.lt.s32.totalorder %s1397_s21, 3 }
   0xa   : > { %p1475_p6 = por %p156_p3, %p42_p0  ;;  %s1399_s27 = smov [#allocation5]  }
   0xb   : > { %s1918_s24 = scalar_select %p1470_p4, 1, 0 }
   0xc   : > { %s1919_s25 = scalar_select %p1475_p6, 1, 0 }
   0xd   : > { %p1480_p8 = pnand %p963_p5, %p163_p7  ;;  %s175_s28 = sshll.u32 %s1399_s27, 4  ;;  %s1484_s28 = int_to_ptr.vmem [resolvable:$true] %s175_s28 }
   0xe   : > { %s1400_s30 = smov [#allocation7]   ;;  %s1241_s9 = scalar_lea.hbm %s1910_s1, 2048 }
   0xf   : > { %p1083_p9 = pneg %p1480_p8  ;;  %s191_s6 = sshll.u32 %s1400_s30, 4  ;;  %s1495_s6 = int_to_ptr.vmem [resolvable:$true] %s191_s6 }
  0x10   : > { %p1242_p12 = scmp.ne.s32.totalorder %s1910_s1, %s1241_s9  ;;  %p1248_p5 = scmp.lt.u32.totalorder %s1241_s9, %s1910_s1 }
  0x11   : > { %p1491_p11 = pnand %p1083_p9, %p1915_p1 }
  0x13   : > { %p1243_p13 = pneg %p1491_p11 }
  0x15   : > { %p1244_p0 = pnand %p1243_p13, %p1242_p12 }
  0x17   : > { %p1245_p3 = pneg %p1244_p0 }
  0x19   : > { %p1250_p7 = pnand %p1248_p5, %p1245_p3 }
  0x1b   : > { %1253 = shalt.err (!%p1250_p7)
}
  0x1c   : > { %s1254_s14 = scalar_lea.vmem %s1484_s28, 2048  ;;  %p1262_p2 = scmp.lt.s32.totalorder %s1484_s28, %s1484_s28 }
  0x1d   : > { %p1255_p9 = scmp.ne.s32.totalorder %s1484_s28, %s1254_s14  ;;  %p1263_p12 = scmp.lt.s32.totalorder %s1254_s14, %s1254_s14 }
  0x1f   : > { %p1257_p10 = pnand %p1255_p9, %p1243_p13  ;;  %p1264_p0 = por %p1263_p12, %p1262_p2 }
  0x21   : > { %p1258_p1 = pneg %p1257_p10 }
  0x23   : > { %p1265_p6 = pnand %p1264_p0, %p1258_p1 }
  0x25   : > { %1268 = shalt.err (!%p1265_p6)
}
  0x26   : > { %s1401_s15 = smov 128   ;;  %s1402_s16 = smov 8  }
  0x27   : > { %1086 = dma.hbm_to_vmem [thread:$0]  (!%p1491_p11), %s1910_s1, 2048, %s1484_s28, [#allocation6], %s1401_s15, %s1401_s15, %s1402_s16  }
  0x28   : > { %s1269_s7 = scalar_lea.hbm %s1912_s3, 1024 }
  0x29   : > { %p1270_p1 = scmp.ne.s32.totalorder %s1912_s3, %s1269_s7  ;;  %p1276_p10 = scmp.lt.u32.totalorder %s1269_s7, %s1912_s3 }
  0x2b   : > { %p1272_p2 = pnand %p1270_p1, %p1243_p13 }
  0x2d   : > { %p1273_p6 = pneg %p1272_p2 }
  0x2f   : > { %p1278_p3 = pnand %p1276_p10, %p1273_p6 }
  0x31   : > { %1281 = shalt.err (!%p1278_p3)
}
  0x32   : > { %s1282_s28 = scalar_lea.vmem %s1495_s6, 1024  ;;  %p1290_p12 = scmp.lt.s32.totalorder %s1495_s6, %s1495_s6 }
  0x33   : > { %p1283_p5 = scmp.ne.s32.totalorder %s1495_s6, %s1282_s28  ;;  %p1291_p0 = scmp.lt.s32.totalorder %s1282_s28, %s1282_s28 }
  0x35   : > { %p1285_p7 = pnand %p1283_p5, %p1243_p13  ;;  %p1292_p1 = por %p1291_p0, %p1290_p12 }
  0x37   : > { %p1286_p9 = pneg %p1285_p7 }
  0x39   : > { %p1293_p2 = pnand %p1292_p1, %p1286_p9 }
  0x3b   : > { %1296 = shalt.err (!%p1293_p2)
}
  0x3c   : > { %s1403_s12 = smov 64   ;;  %s1404_s13 = smov 4  }
  0x3d   : > { %1089 = dma.hbm_to_vmem [thread:$0]  (!%p1491_p11), %s1912_s3, 1024, %s1495_s6, [#allocation6], %s1403_s12, %s1403_s12, %s1404_s13  }
  0x3e   : > { %s1553_s23 = sadd.s32 1, %s1397_s21   ;;  %s29_s30 = sadd.s32 1, %s1393_s20 }
  0x3f   : > { %s26_s27 = ssub.s32 %s1397_s21, %s1553_s23  ;;  %p36_p6 = scmp.ne.s32.totalorder %s1393_s20, %s1389_s19 }
  0x40   : > { %p27_p13 = scmp.eq.s32.totalorder %s26_s27, 0  ;;  %p37_p10 = scmp.eq.s32.totalorder %s1397_s21, 0 }
  0x41   : > { %p1922_p5 = scmp.eq.s32.totalorder %s1461_s22, 1  ;;  %p1100_p9 = scmp.lt.s32.totalorder %s1397_s21, 2 }
  0x42   : > { %s1562_s7 = scalar_select %p27_p13, %s1393_s20, %s29_s30  }
  0x43   : > { %p38_p3 = por %p37_p10, %p36_p6  ;;  %p1566_p7 = por %p1922_p5, %p36_p6 }
  0x44   : > { %s208_s29 = sand.u32 1, %s1393_s20   ;;  %s1021_s6 = sshll.u32 %s1397_s21, 11 }
  0x45   : > { %s1923_s8 = scalar_select %p1566_p7, 1, 0 }
  0x46   : > { %s967_s9 = sshll.u32 %s208_s29, 7  ;;  %s1576_s28 = scalar_lea.hbm %s1909_s0, %s1021_s6 }
  0x47   : > { %s212_s12 = scalar_lea.vmem [#allocation2], %s967_s9  ;;  %p1580_p11 = pnand %p1100_p9, %p38_p3 }
  0x48   : > { %s219_s13 = sshll.u32 %s212_s12, 4  ;;  %s1584_s17 = scalar_lea.sflag [#allocation3], %s208_s29  ;;  %s1578_s13 = int_to_ptr.vmem [resolvable:$true] %s219_s13 }
  0x49   : > { %s1297_s27 = scalar_lea.hbm %s1576_s28, 2048  ;;  %p1299_p0 = pneg %p1580_p11 }
  0x4a   : > { %p1298_p12 = scmp.ne.s32.totalorder %s1576_s28, %s1297_s27  ;;  %s1302_s6 = scalar_lea.hbm %s1909_s0, 4096 }
  0x4b   : > { %p1303_p13 = scmp.lt.u32.totalorder %s1576_s28, %s1909_s0  ;;  %p1304_p6 = scmp.lt.u32.totalorder %s1302_s6, %s1297_s27 }
  0x4c   : > { %p1300_p1 = pnand %p1299_p0, %p1298_p12  ;;  %p1306_p3 = scmp.lt.u32.totalorder %s1297_s27, %s1576_s28 }
  0x4d   : > { %p1305_p10 = por %p1304_p6, %p1303_p13 }
  0x4e   : > { %p1301_p2 = pneg %p1300_p1 }
  0x4f   : > { %p1307_p5 = por %p1306_p3, %p1305_p10 }
  0x51   : > { %p1308_p9 = pnand %p1307_p5, %p1301_p2 }
  0x53   : > { %1311 = shalt.err (!%p1308_p9)
}
  0x54   : > { %s1312_s29 = scalar_lea.vmem %s1578_s13, 2048  ;;  %s1405_s12 = smov [#allocation2]  }
  0x55   : > { %p1313_p12 = scmp.ne.s32.totalorder %s1578_s13, %s1312_s29  ;;  %s1317_s30 = sshll.u32 %s1405_s12, 4  ;;  %s1318_s30 = int_to_ptr.vmem [resolvable:$false] %s1317_s30 }
  0x56   : > { %s1319_s9 = scalar_lea.vmem %s1318_s30, 4096  ;;  %p1320_p4 = scmp.lt.s32.totalorder %s1578_s13, %s1318_s30 }
  0x57   : > { %p1315_p1 = pnand %p1313_p12, %p1299_p0  ;;  %p1321_p13 = scmp.lt.s32.totalorder %s1319_s9, %s1312_s29 }
  0x59   : > { %p1316_p7 = pneg %p1315_p1  ;;  %p1322_p6 = por %p1321_p13, %p1320_p4 }
  0x5b   : > { %p1323_p10 = pnand %p1322_p6, %p1316_p7 }
  0x5d   : > { %1326 = shalt.err (!%p1323_p10)
}
  0x5e   : > { %1093 = dma.hbm_to_vmem [thread:$0]  (!%p1580_p11), %s1576_s28, 2048, %s1578_s13, %s1584_s17, %s1401_s15, %s1401_s15, %s1402_s16  }
  0x5f   : > { %231 = sbr.rel (%p1480_p8) target bundleno = 652 (0x28c), region = 40  ;;  %s1618_s27 = sand.u32 (!%p1480_p8), 1, %s1389_s19  }
  0x60   : > { %s971_s6 = sshll.u32 (!%p1480_p8), %s1618_s27, 7  ;;  %s234_s10 = scalar_lea.sflag (!%p1480_p8), [#allocation3], %s1618_s27 }
  0x61   : > { %s1624_s14 = scalar_lea.vmem (!%p1480_p8), [#allocation2], %s971_s6  ;;  %p1925_p4 = scmp.ne.s32.totalorder (!%p1480_p8), %s1918_s24, 0 }
  0x66   : > { %1372 = dma.done.wait (%p1925_p4), %s234_s10, 2048  }
  0x67   : > { %1374 = vsyncadd (%p1925_p4), %s234_s10, 4294965248  ;;  %p1926_p7 = scmp.eq.s32.totalorder %s1461_s22, 0 }
  0x69   : > { %1376 = dma.done.wait (%p1926_p7), [#allocation6], 3072   ;;  %p1927_p8 = pmov %p1926_p7 }
  0x6a   : > { %v1406_v0 = vmov 0   ;;  %v1145_v1 = vld [vmem:[#allocation5 + $0x4] ss:$8 sps:$4 sm:$0xff]   ;;  %v1147_v2 = vld [vmem:[#allocation5] ss:$8 sps:$4 sm:$0xff]   ;;  %v1171_v16 = vld [vmem:[#allocation7 + $0x10] sm:$0xff]   ;;  %v317_v49 = vlaneseq }
  0x6b   : > { %1378 = vsyncadd (%p1927_p8), [#allocation6], 4294964224  ;;  %439 = vmatprep.mubr.bf16.mxu0 %v1406_v0  ;;  %407 = vmatprep.subr.bf16.mxu0 %v1145_v1  ;;  %v1148_v3 = vld [vmem:[#allocation5 + $0x14] ss:$8 sps:$4 sm:$0xff]   ;;  %v1150_v4 = vld [vmem:[#allocation5 + $0x10] ss:$8 sps:$4 sm:$0xff]  }
  0x6c   : > { %408 = vmatpush1.bf16.msra.mxu0 %v1147_v2  ;;  %v1151_v5 = vld [vmem:[#allocation5 + $0x24] ss:$8 sps:$4 sm:$0xff]   ;;  %v1153_v6 = vld [vmem:[#allocation5 + $0x20] ss:$8 sps:$4 sm:$0xff]   ;;  %v1154_v7 = vld [vmem:[#allocation5 + $0x34] ss:$8 sps:$4 sm:$0xff]  }
  0x6d   : > { %409 = vmatprep.subr.bf16.mxu0 %v1148_v3  ;;  %v1156_v8 = vld [vmem:[#allocation5 + $0x30] ss:$8 sps:$4 sm:$0xff]   ;;  %v1157_v9 = vld [vmem:[#allocation5 + $0x44] ss:$8 sps:$4 sm:$0xff]   ;;  %v1159_v10 = vld [vmem:[#allocation5 + $0x40] ss:$8 sps:$4 sm:$0xff]  }
  0x6e   : > { %v1160_v11 = vld [vmem:[#allocation5 + $0x54] ss:$8 sps:$4 sm:$0xff]   ;;  %v1169_v12 = vld [vmem:[#allocation7] sm:$0xff]   ;;  %v1170_v13 = vld [vmem:[#allocation7 + $0x8] sm:$0xff]   ;;  %v1706_v50 = vshrl.u32 %v317_v49, 7  ;;  %s1806_s28 = scalar_lea.vmem [#allocation8], %s971_s6 }
  0x6f   : > { %v1162_v14 = vld [vmem:[#allocation5 + $0x50] ss:$8 sps:$4 sm:$0xff]   ;;  %1039 = vmatprep.subr.bf16.mxu1 %v1169_v12  ;;  %v1163_v15 = vld [vmem:[#allocation5 + $0x64] ss:$8 sps:$4 sm:$0xff]   ;;  %v1165_v17 = vld [vmem:[#allocation5 + $0x60] ss:$8 sps:$4 sm:$0xff]  }
  0x70   : > { %410 = vmatpush1.bf16.msra.mxu0 %v1150_v4  ;;  %1040 = vmatpush3.bf16.msra.mxu1 %v1169_v12  ;;  %v1166_v18 = vld [vmem:[#allocation5 + $0x74] ss:$8 sps:$4 sm:$0xff]   ;;  %v1168_v20 = vld [vmem:[#allocation5 + $0x70] ss:$8 sps:$4 sm:$0xff]   ;;  %v1636_v21 = vld [vmem:[%s1624_s14] sm:$0xff]  ;;  %v323_v51 = vsub.s32 1, %v1706_v50 }
  0x71   : > { %411 = vmatprep.subr.bf16.mxu0 %v1151_v5  ;;  %1041 = vmatprep.subr.bf16.mxu1 %v1170_v13  ;;  %v1172_v19 = vld [vmem:[#allocation7 + $0x18] sm:$0xff]   ;;  %v1639_v22 = vld [vmem:[%s1624_s14 + $0x8] sm:$0xff]  ;;  %v1645_v24 = vld [vmem:[%s1624_s14 + $0x10] sm:$0xff]  ;;  %s1022_s13 = sshll.u32 %s1461_s22, 11  ;;  %s870_s17 = sshll.u32 %s1806_s28, 4  ;;  %s1861_s17 = int_to_ptr.vmem [resolvable:$true] %s870_s17 }
  0x72   : > { %v291_v23 = vpack.c.bf16 %v1639_v22, %v1636_v21  ;;  %v1648_v25 = vld [vmem:[%s1624_s14 + $0x18] sm:$0xff]  ;;  %v1654_v27 = vld [vmem:[%s1624_s14 + $0x20] sm:$0xff]  ;;  %v1657_v28 = vld [vmem:[%s1624_s14 + $0x28] sm:$0xff]  ;;  %s1859_s12 = scalar_lea.hbm %s1914_s5, %s1022_s13  ;;  %s857_s22 = scalar_lea.sflag [#allocation4], %s1618_s27 }
  0x73   : > { %v292_v26 = vpack.c.bf16 %v1648_v25, %v1645_v24  ;;  %v293_v29 = vpack.c.bf16 %v1657_v28, %v1654_v27  ;;  %v1663_v30 = vld [vmem:[%s1624_s14 + $0x30] sm:$0xff]  ;;  %v1666_v31 = vld [vmem:[%s1624_s14 + $0x38] sm:$0xff]  ;;  %v1672_v33 = vld [vmem:[%s1624_s14 + $0x40] sm:$0xff]  ;;  %s1327_s30 = scalar_lea.vmem %s1861_s17, 2048  ;;  %p1928_p0 = scmp.ne.s32.totalorder %s1923_s8, 0 }
  0x74   : > { %412 = vmatpush1.bf16.msra.mxu0 %v1153_v6  ;;  %1042 = vmatpush3.bf16.msra.mxu1 %v1170_v13  ;;  %v294_v32 = vpack.c.bf16 %v1666_v31, %v1663_v30  ;;  %v1675_v34 = vld [vmem:[%s1624_s14 + $0x48] sm:$0xff]  ;;  %v1681_v36 = vld [vmem:[%s1624_s14 + $0x50] sm:$0xff]  ;;  %v1684_v37 = vld [vmem:[%s1624_s14 + $0x58] sm:$0xff]  ;;  %p1328_p11 = scmp.ne.s32.totalorder %s1861_s17, %s1327_s30  ;;  %s1407_s9 = smov [#allocation8]  }
  0x75   : > { %413 = vmatprep.subr.bf16.mxu0 %v1154_v7  ;;  %1043 = vmatprep.subr.bf16.mxu1 %v1171_v16  ;;  %v295_v35 = vpack.c.bf16 %v1675_v34, %v1672_v33  ;;  %v296_v38 = vpack.c.bf16 %v1684_v37, %v1681_v36  ;;  %v1690_v39 = vld [vmem:[%s1624_s14 + $0x60] sm:$0xff]  ;;  %v1693_v40 = vld [vmem:[%s1624_s14 + $0x68] sm:$0xff]  ;;  %v1699_v42 = vld [vmem:[%s1624_s14 + $0x70] sm:$0xff]  ;;  %s1331_s6 = sshll.u32 %s1407_s9, 4  ;;  %s1332_s6 = int_to_ptr.vmem [resolvable:$false] %s1331_s6 }
  0x76   : > { %v297_v41 = vpack.c.bf16 %v1693_v40, %v1690_v39  ;;  %v1702_v43 = vld [vmem:[%s1624_s14 + $0x78] sm:$0xff]  ;;  %v1173_v45 = vld [vmem:[#allocation7 + $0x20] sm:$0xff]   ;;  %v1174_v46 = vld [vmem:[#allocation7 + $0x28] sm:$0xff]   ;;  %p1329_p2 = pnand %p1328_p11, %p1928_p0  ;;  %s1333_s10 = scalar_lea.vmem %s1332_s6, 4096 }
  0x77   : > { %v298_v44 = vpack.c.bf16 %v1702_v43, %v1699_v42  ;;  %v1175_v47 = vld [vmem:[#allocation7 + $0x30] sm:$0xff]   ;;  %v1176_v48 = vld [vmem:[#allocation7 + $0x38] sm:$0xff]   ;;  %v1712_v52 = vld [vmem:[%s1911_s2] sm:$0x3]  ;;  %p1334_p5 = scmp.lt.s32.totalorder %s1861_s17, %s1332_s6  ;;  %p1335_p9 = scmp.lt.s32.totalorder %s1333_s10, %s1327_s30 }
  0x78   : > { %414 = vmatpush1.bf16.msra.mxu0 %v1156_v8  ;;  %1044 = vmatpush3.bf16.msra.mxu1 %v1171_v16  ;;  %v1715_v53 = vrot.slane %v1712_v52, %v323_v51  ;;  %p1330_p3 = pneg %p1329_p2 }
  0x79   : > { %415 = vmatprep.subr.bf16.mxu0 %v1157_v9  ;;  %1045 = vmatprep.subr.bf16.mxu1 %v1172_v19  ;;  %p1336_p12 = por %p1335_p9, %p1334_p5 }
  0x7b   : > { %p1337_p1 = pnand %p1336_p12, %p1330_p3 }
  0x7c   : > { %416 = vmatpush1.bf16.msra.mxu0 %v1159_v10  ;;  %1046 = vmatpush3.bf16.msra.mxu1 %v1172_v19 }
  0x7d   : > { %417 = vmatprep.subr.bf16.mxu0 %v1160_v11  ;;  %1047 = vmatprep.subr.bf16.mxu1 %v1173_v45 }
  0x80   : > { %418 = vmatpush1.bf16.msra.mxu0 %v1162_v14  ;;  %1048 = vmatpush3.bf16.msra.mxu1 %v1173_v45 }
  0x81   : > { %419 = vmatprep.subr.bf16.mxu0 %v1163_v15  ;;  %1049 = vmatprep.subr.bf16.mxu1 %v1174_v46 }
  0x84   : > { %420 = vmatpush1.bf16.msra.mxu0 %v1165_v17  ;;  %1050 = vmatpush3.bf16.msra.mxu1 %v1174_v46 }
  0x85   : > { %421 = vmatprep.subr.bf16.mxu0 %v1166_v18  ;;  %1051 = vmatprep.subr.bf16.mxu1 %v1175_v47 }
  0x88   : > { %422 = vmatpush1.bf16.msra.mxu0 %v1168_v20  ;;  %1052 = vmatpush3.bf16.msra.mxu1 %v1175_v47 }
  0x89   : > { %1053 = vmatprep.subr.bf16.mxu1 %v1176_v48 }
  0x8b   : > { %440 = vmatmul.mubr.bf16.vlgmr.msra.gmra.mrb[0].mxu0 %v291_v23 }
  0x8c   : > { %449 = vmatprep.mubr.bf16.mxu0 %v1406_v0  ;;  %1054 = vmatpush3.bf16.msra.mxu1 %v1176_v48 }
  0x93   : > { %450 = vmatmul.mubr.bf16.gmra.mrb[4].mxu0 %v292_v26 }
  0x94   : > { %459 = vmatprep.mubr.bf16.mxu0 %v1406_v0 }
  0x9b   : > { %460 = vmatmul.mubr.bf16.gmra.mrb[8].mxu0 %v293_v29 }
  0x9c   : > { %469 = vmatprep.mubr.bf16.mxu0 %v1406_v0 }
  0xa3   : > { %470 = vmatmul.mubr.bf16.gmra.mrb[12].mxu0 %v294_v32 }
  0xa4   : > { %479 = vmatprep.mubr.bf16.mxu0 %v1406_v0 }
  0xab   : > { %480 = vmatmul.mubr.bf16.gmra.mrb[16].mxu0 %v295_v35 }
  0xac   : > { %489 = vmatprep.mubr.bf16.mxu0 %v1406_v0 }
  0xb3   : > { %490 = vmatmul.mubr.bf16.gmra.mrb[20].mxu0 %v296_v38 }
  0xb4   : > { %499 = vmatprep.mubr.bf16.mxu0 %v1406_v0 }
  0xbb   : > { %500 = vmatmul.mubr.bf16.gmra.mrb[24].mxu0 %v297_v41 }
  0xbc   : > { %509 = vmatprep.mubr.bf16.mxu0 %v1406_v0 }
  0xc3   : > { %510 = vmatmul.mubr.bf16.gmra.mrb[28].mxu0 %v298_v44 }
 0x15e   : > { %v1717_v54 = vpop.f32.mrb[0].mxu0 }
 0x15f   : > { %v443_v55 = vpop.f32.mrb[1].mxu0 }
 0x160   : > { %v444_v56 = vadd.f32 %v443_v55, %v1715_v53  ;;  %v1720_v57 = vpop.f32.mrb[2].mxu0 }
 0x161   : > { %v447_v58 = vpop.f32.mrb[3].mxu0 }
 0x162   : > { %v448_v59 = vadd.f32 %v447_v58, %v1715_v53  ;;  %v616_v60 = vmax.f32 %v444_v56, 0.0 }
 0x164   : > { %v617_v61 = vmax.f32 %v448_v59, 0.0 }
 0x166   : > { %v1723_v62 = vpop.f32.mrb[4].mxu0  ;;  %v632_v63 = vpack.c.bf16 %v617_v61, %v616_v60 }
 0x167   : > { %v453_v0 = vpop.f32.mrb[5].mxu0 }
 0x168   : > { %v454_v1 = vadd.f32 %v453_v0, %v1715_v53  ;;  %v1726_v2 = vpop.f32.mrb[6].mxu0  ;;  %1055 = vmatprep.mubr.bf16.mxu1 %v632_v63 }
 0x169   : > { %v457_v3 = vpop.f32.mrb[7].mxu0 }
 0x16a   : > { %v458_v4 = vadd.f32 %v457_v3, %v1715_v53  ;;  %v618_v5 = vmax.f32 %v454_v1, 0.0 }
 0x16c   : > { %v619_v6 = vmax.f32 %v458_v4, 0.0 }
 0x16e   : > { %v633_v7 = vpack.c.bf16 %v619_v6, %v618_v5  ;;  %v1729_v8 = vpop.f32.mrb[8].mxu0 }
 0x16f   : > { %v463_v9 = vpop.f32.mrb[9].mxu0 }
 0x170   : > { %v464_v10 = vadd.f32 %v463_v9, %v1715_v53  ;;  %v1732_v11 = vpop.f32.mrb[10].mxu0  ;;  %1056 = vmatmul.mubr.bf16.vlgmr.msra.gmra.mrb[0].mxu1 %v633_v7 }
 0x171   : > { %v467_v12 = vpop.f32.mrb[11].mxu0 }
 0x172   : > { %v468_v13 = vadd.f32 %v467_v12, %v1715_v53  ;;  %v620_v14 = vmax.f32 %v464_v10, 0.0 }
 0x174   : > { %v621_v15 = vmax.f32 %v468_v13, 0.0 }
 0x176   : > { %v634_v16 = vpack.c.bf16 %v621_v15, %v620_v14  ;;  %v1735_v17 = vpop.f32.mrb[12].mxu0 }
 0x177   : > { %v473_v18 = vpop.f32.mrb[13].mxu0 }
 0x178   : > { %v474_v19 = vadd.f32 %v473_v18, %v1715_v53  ;;  %v1738_v20 = vpop.f32.mrb[14].mxu0  ;;  %1059 = vmatprep.mubr.bf16.mxu1 %v634_v16 }
 0x179   : > { %v477_v23 = vpop.f32.mrb[15].mxu0 }
 0x17a   : > { %v478_v26 = vadd.f32 %v477_v23, %v1715_v53  ;;  %v622_v29 = vmax.f32 %v474_v19, 0.0 }
 0x17c   : > { %v623_v32 = vmax.f32 %v478_v26, 0.0 }
 0x17e   : > { %v635_v35 = vpack.c.bf16 %v623_v32, %v622_v29  ;;  %v1741_v38 = vpop.f32.mrb[16].mxu0 }
 0x17f   : > { %v483_v41 = vpop.f32.mrb[17].mxu0 }
 0x180   : > { %v484_v44 = vadd.f32 %v483_v41, %v1715_v53  ;;  %v1744_v45 = vpop.f32.mrb[18].mxu0  ;;  %1060 = vmatmul.mubr.bf16.gmra.mrb[4].mxu1 %v635_v35  ;;  %v319_v35 = vsub.s32 0, %v1706_v50 }
 0x181   : > { %v487_v46 = vpop.f32.mrb[19].mxu0 }
 0x182   : > { %v488_v47 = vadd.f32 %v487_v46, %v1715_v53  ;;  %v624_v48 = vmax.f32 %v484_v44, 0.0  ;;  %v1767_v41 = vrot.slane %v1712_v52, %v319_v35 }
 0x184   : > { %v625_v49 = vmax.f32 %v488_v47, 0.0  ;;  %v442_v44 = vadd.f32 %v1717_v54, %v1767_v41  ;;  %v452_v46 = vadd.f32 %v1723_v62, %v1767_v41  ;;  %v462_v52 = vadd.f32 %v1729_v8, %v1767_v41 }
 0x185   : > { %v466_v62 = vadd.f32 %v1732_v11, %v1767_v41 }
 0x186   : > { %v636_v51 = vpack.c.bf16 %v625_v49, %v624_v48  ;;  %v1747_v55 = vpop.f32.mrb[20].mxu0  ;;  %v991_v47 = vmul.f32 -1.442695, %v442_v44  ;;  %v456_v48 = vadd.f32 %v1726_v2, %v1767_v41  ;;  %v993_v49 = vmul.f32 -1.442695, %v452_v46 }
 0x187   : > { %v493_v56 = vpop.f32.mrb[21].mxu0  ;;  %v472_v2 = vadd.f32 %v1735_v17, %v1767_v41  ;;  %v482_v17 = vadd.f32 %v1741_v38, %v1767_v41 }
 0x188   : > { %v494_v58 = vadd.f32 %v493_v56, %v1715_v53  ;;  %v1750_v59 = vpop.f32.mrb[22].mxu0  ;;  %1063 = vmatprep.mubr.bf16.mxu1 %v636_v51  ;;  %1177 = vpow2.f32 %v991_v47  ;;  %v994_v51 = vmul.f32 -1.442695, %v456_v48  ;;  %v995_v56 = vmul.f32 -1.442695, %v462_v52 }
 0x189   : > { %v497_v60 = vpop.f32.mrb[23].mxu0  ;;  %1179 = vpow2.f32 %v993_v49  ;;  %v496_v38 = vadd.f32 %v1750_v59, %v1767_v41 }
 0x18a   : > { %v498_v61 = vadd.f32 %v497_v60, %v1715_v53  ;;  %v626_v63 = vmax.f32 %v494_v58, 0.0  ;;  %1181 = vpow2.f32 %v994_v51  ;;  %v476_v60 = vadd.f32 %v1738_v20, %v1767_v41 }
 0x18c   : > { %v627_v0 = vmax.f32 %v498_v61, 0.0  ;;  %v996_v61 = vmul.f32 -1.442695, %v466_v62  ;;  %v998_v8 = vmul.f32 -1.442695, %v476_v60 }
 0x18e   : > { %v637_v1 = vpack.c.bf16 %v627_v0, %v626_v63  ;;  %v1753_v3 = vpop.f32.mrb[24].mxu0  ;;  %v997_v0 = vmul.f32 -1.442695, %v472_v2 }
 0x18f   : > { %v503_v4 = vpop.f32.mrb[25].mxu0 }
 0x190   : > { %v504_v5 = vadd.f32 %v503_v4, %v1715_v53  ;;  %v1756_v6 = vpop.f32.mrb[26].mxu0  ;;  %1064 = vmatmul.mubr.bf16.gmra.mrb[8].mxu1 %v637_v1 }
 0x191   : > { %v507_v7 = vpop.f32.mrb[27].mxu0 }
 0x192   : > { %v508_v9 = vadd.f32 %v507_v7, %v1715_v53  ;;  %v628_v10 = vmax.f32 %v504_v5, 0.0  ;;  %v1178_v54 = vpop.eup %1177  ;;  %v486_v7 = vadd.f32 %v1744_v45, %v1767_v41 }
 0x193   : > { %v1180_v58 = vpop.eup %1179 }
 0x194   : > { %v629_v12 = vmax.f32 %v508_v9, 0.0  ;;  %v1182_v63 = vpop.eup %1181  ;;  %v570_v4 = vadd.f32 1.0, %v1180_v58  ;;  %v1792_v9 = vld [vmem:[%s1913_s4] ss:$0 sm:$0xff] }
 0x195   : > { %v571_v5 = vadd.f32 1.0, %v1182_v63  ;;  %v502_v63 = vadd.f32 %v1753_v3, %v1767_v41 }
 0x196   : > { %v638_v13 = vpack.c.bf16 %v629_v12, %v628_v10  ;;  %v1759_v14 = vpop.f32.mrb[28].mxu0  ;;  %v999_v12 = vmul.f32 -1.442695, %v482_v17 }
 0x197   : > { %v513_v15 = vpop.f32.mrb[29].mxu0 }
 0x198   : > { %v514_v16 = vadd.f32 %v513_v15, %v1715_v53  ;;  %v1762_v18 = vpop.f32.mrb[30].mxu0  ;;  %1067 = vmatprep.mubr.bf16.mxu1 %v638_v13  ;;  %v492_v13 = vadd.f32 %v1747_v55, %v1767_v41 }
 0x199   : > { %v517_v19 = vpop.f32.mrb[31].mxu0  ;;  %v516_v17 = vadd.f32 %v1762_v18, %v1767_v41 }
 0x19a   : > { %v518_v23 = vadd.f32 %v517_v19, %v1715_v53  ;;  %v630_v26 = vmax.f32 %v514_v16, 0.0  ;;  %v446_v53 = vadd.f32 %v1720_v57, %v1767_v41  ;;  %v568_v57 = vadd.f32 1.0, %v1178_v54 }
 0x19b   : > { %v1001_v47 = vmul.f32 -1.442695, %v492_v13  ;;  %v1002_v54 = vmul.f32 -1.442695, %v496_v38 }
 0x19c   : > { %v631_v29 = vmax.f32 %v518_v23, 0.0  ;;  %v992_v50 = vmul.f32 -1.442695, %v446_v53 }
 0x19e   : > { %v639_v32 = vpack.c.bf16 %v631_v29, %v630_v26  ;;  %1183 = vpow2.f32 %v992_v50 }
 0x19f   : > { %1185 = vpow2.f32 %v995_v56 }
 0x1a0   : > { %1068 = vmatmul.mubr.bf16.gmra.mrb[12].mxu1 %v639_v32  ;;  %1187 = vrcp.f32 %v568_v57  ;;  %v1000_v32 = vmul.f32 -1.442695, %v486_v7 }
 0x1a1   : > { %1189 = vpow2.f32 %v996_v61 }
 0x1a2   : > { %1191 = vpow2.f32 %v997_v0  ;;  %v506_v0 = vadd.f32 %v1756_v6, %v1767_v41 }
 0x1a3   : > { %1193 = vrcp.f32 %v570_v4 }
 0x1a4   : > { %1195 = vpow2.f32 %v998_v8  ;;  %v1004_v3 = vmul.f32 -1.442695, %v506_v0 }
 0x1a5   : > { %1197 = vrcp.f32 %v571_v5 }
 0x1a8   : > { %v1184_v1 = vpop.eup %1183 }
 0x1a9   : > { %v569_v11 = vadd.f32 1.0, %v1184_v1  ;;  %v1186_v20 = vpop.eup %1185 }
 0x1aa   : > { %v1188_v10 = vpop.eup %1187  ;;  %v572_v23 = vadd.f32 1.0, %v1186_v20 }
 0x1ab   : > { %1199 = vrcp.f32 %v569_v11  ;;  %v1190_v15 = vpop.eup %1189  ;;  %v1003_v11 = vmul.f32 -1.442695, %v502_v63 }
 0x1ac   : > { %v1192_v19 = vpop.eup %1191  ;;  %1201 = vpow2.f32 %v999_v12  ;;  %v573_v60 = vadd.f32 1.0, %v1190_v15 }
 0x1ad   : > { %v1194_v29 = vpop.eup %1193  ;;  %v574_v51 = vadd.f32 1.0, %v1192_v19  ;;  %1203 = vrcp.f32 %v572_v23 }
 0x1ae   : > { %v1196_v46 = vpop.eup %1195  ;;  %1205 = vpow2.f32 %v1000_v32 }
 0x1af   : > { %v1198_v49 = vpop.eup %1197  ;;  %v575_v56 = vadd.f32 1.0, %v1196_v46  ;;  %1207 = vpow2.f32 %v1001_v47 }
 0x1b0   : > { %1209 = vrcp.f32 %v574_v51 }
 0x1b1   : > { %1211 = vpow2.f32 %v1002_v54 }
 0x1b2   : > { %1213 = vrcp.f32 %v575_v56 }
 0x1b3   : > { %1215 = vrcp.f32 %v573_v60 }
 0x1b5   : > { %v1200_v52 = vpop.eup %1199 }
 0x243   : > { %v1057_v16 = vpop.f32.mrb[0].mxu1 }
 0x244   : > { %v754_v26 = vadd.f32 %v1057_v16, %v1792_v9  ;;  %v745_v45 = vpop.f32.mrb[1].mxu1 }
 0x245   : > { %v746_v35 = vadd.f32 %v1792_v9, %v745_v45  ;;  %v1058_v44 = vpop.f32.mrb[2].mxu1  ;;  %v1006_v45 = vmul.f32 -1.442695, %v516_v17 }
 0x246   : > { %v810_v48 = vmul.f32 %v1194_v29, %v754_v26  ;;  %v757_v55 = vadd.f32 %v1058_v44, %v1792_v9  ;;  %v748_v53 = vpop.f32.mrb[3].mxu1 }
 0x247   : > { %v808_v50 = vmul.f32 %v1188_v10, %v746_v35  ;;  %v749_v59 = vadd.f32 %v1792_v9, %v748_v53 }
 0x248   : > { %v826_v62 = vadd.f32 %v810_v48, %v1645_v24  ;;  %v811_v2 = vmul.f32 %v1198_v49, %v757_v55 }
 0x249   : > { %v824_v58 = vadd.f32 %v808_v50, %v1636_v21  ;;  %v809_v57 = vmul.f32 %v1200_v52, %v749_v59  ;;  %v1202_v21 = vpop.eup %1201 }
 0x24a   : > { %842 = vst [vmem:[%s1806_s28 + $0x10] sm:$0xff] %v826_v62  ;;  %v827_v61 = vadd.f32 %v811_v2, %v1648_v25  ;;  %v1204_v1 = vpop.eup %1203  ;;  %v512_v25 = vadd.f32 %v1759_v14, %v1767_v41  ;;  %v576_v8 = vadd.f32 1.0, %v1202_v21 }
 0x24b   : > { %840 = vst [vmem:[%s1806_s28] sm:$0xff] %v824_v58  ;;  %v825_v24 = vadd.f32 %v809_v57, %v1639_v22  ;;  %v1206_v4 = vpop.eup %1205 }
 0x24c   : > { %843 = vst [vmem:[%s1806_s28 + $0x18] sm:$0xff] %v827_v61  ;;  %v1208_v22 = vpop.eup %1207  ;;  %v1005_v15 = vmul.f32 -1.442695, %v512_v25  ;;  %1217 = vrcp.f32 %v576_v8  ;;  %v577_v47 = vadd.f32 1.0, %v1206_v4 }
 0x24d   : > { %841 = vst [vmem:[%s1806_s28 + $0x8] sm:$0xff] %v825_v24  ;;  %v1210_v10 = vpop.eup %1209  ;;  %v578_v38 = vadd.f32 1.0, %v1208_v22  ;;  %1219 = vpow2.f32 %v1003_v11 }
 0x24e   : > { %v1212_v13 = vpop.eup %1211  ;;  %1221 = vpow2.f32 %v1004_v3 }
 0x24f   : > { %v1214_v23 = vpop.eup %1213  ;;  %v579_v35 = vadd.f32 1.0, %v1212_v13  ;;  %1223 = vpow2.f32 %v1005_v15 }
 0x250   : > { %v1216_v41 = vpop.eup %1215  ;;  %1225 = vrcp.f32 %v578_v38 }
 0x251   : > { %1227 = vpow2.f32 %v1006_v45 }
 0x252   : > { %1229 = vrcp.f32 %v579_v35 }
 0x253   : > { %v1061_v5 = vpop.f32.mrb[4].mxu1  ;;  %1231 = vrcp.f32 %v577_v47 }
 0x254   : > { %v770_v20 = vadd.f32 %v1061_v5, %v1792_v9  ;;  %v761_v7 = vpop.f32.mrb[5].mxu1 }
 0x255   : > { %v762_v12 = vadd.f32 %v1792_v9, %v761_v7  ;;  %v1062_v6 = vpop.f32.mrb[6].mxu1 }
 0x256   : > { %v814_v16 = vmul.f32 %v1210_v10, %v770_v20  ;;  %v773_v14 = vadd.f32 %v1062_v6, %v1792_v9  ;;  %v764_v19 = vpop.f32.mrb[7].mxu1 }
 0x257   : > { %v812_v26 = vmul.f32 %v1204_v1, %v762_v12  ;;  %v765_v18 = vadd.f32 %v1792_v9, %v764_v19 }
 0x258   : > { %v830_v29 = vadd.f32 %v814_v16, %v1663_v30  ;;  %v815_v32 = vmul.f32 %v1214_v23, %v773_v14  ;;  %v1218_v30 = vpop.eup %1217 }
 0x259   : > { %v828_v44 = vadd.f32 %v812_v26, %v1654_v27  ;;  %v813_v46 = vmul.f32 %v1216_v41, %v765_v18  ;;  %v1220_v53 = vpop.eup %1219 }
 0x25a   : > { %846 = vst [vmem:[%s1806_s28 + $0x30] sm:$0xff] %v830_v29  ;;  %v831_v48 = vadd.f32 %v815_v32, %v1666_v31  ;;  %v1222_v49 = vpop.eup %1221  ;;  %v580_v21 = vadd.f32 1.0, %v1220_v53 }
 0x25b   : > { %844 = vst [vmem:[%s1806_s28 + $0x20] sm:$0xff] %v828_v44  ;;  %v829_v55 = vadd.f32 %v813_v46, %v1657_v28  ;;  %v1224_v27 = vpop.eup %1223  ;;  %v581_v8 = vadd.f32 1.0, %v1222_v49 }
 0x25c   : > { %847 = vst [vmem:[%s1806_s28 + $0x38] sm:$0xff] %v831_v48  ;;  %v1226_v52 = vpop.eup %1225  ;;  %v582_v57 = vadd.f32 1.0, %v1224_v27 }
 0x25d   : > { %845 = vst [vmem:[%s1806_s28 + $0x28] sm:$0xff] %v829_v55  ;;  %v1228_v62 = vpop.eup %1227 }
 0x25e   : > { %v1230_v58 = vpop.eup %1229  ;;  %v583_v1 = vadd.f32 1.0, %v1228_v62  ;;  %1233 = vrcp.f32 %v582_v57 }
 0x25f   : > { %v1232_v24 = vpop.eup %1231  ;;  %1235 = vrcp.f32 %v580_v21 }
 0x260   : > { %1237 = vrcp.f32 %v583_v1 }
 0x261   : > { %1239 = vrcp.f32 %v581_v8 }
 0x263   : > { %v1065_v51 = vpop.f32.mrb[8].mxu1 }
 0x264   : > { %v786_v50 = vadd.f32 %v1065_v51, %v1792_v9  ;;  %v777_v59 = vpop.f32.mrb[9].mxu1 }
 0x265   : > { %v778_v31 = vadd.f32 %v1792_v9, %v777_v59  ;;  %v1066_v54 = vpop.f32.mrb[10].mxu1 }
 0x266   : > { %v818_v28 = vmul.f32 %v1226_v52, %v786_v50  ;;  %v789_v2 = vadd.f32 %v1066_v54, %v1792_v9  ;;  %v780_v56 = vpop.f32.mrb[11].mxu1 }
 0x267   : > { %v816_v60 = vmul.f32 %v1218_v30, %v778_v31  ;;  %v781_v61 = vadd.f32 %v1792_v9, %v780_v56 }
 0x268   : > { %v834_v63 = vadd.f32 %v818_v28, %v1681_v36  ;;  %v819_v0 = vmul.f32 %v1230_v58, %v789_v2  ;;  %v1234_v17 = vpop.eup %1233 }
 0x269   : > { %v832_v25 = vadd.f32 %v816_v60, %v1672_v33  ;;  %v817_v4 = vmul.f32 %v1232_v24, %v781_v61  ;;  %v1236_v7 = vpop.eup %1235 }
 0x26a   : > { %850 = vst [vmem:[%s1806_s28 + $0x50] sm:$0xff] %v834_v63  ;;  %v835_v5 = vadd.f32 %v819_v0, %v1684_v37  ;;  %v1238_v12 = vpop.eup %1237 }
 0x26b   : > { %848 = vst [vmem:[%s1806_s28 + $0x40] sm:$0xff] %v832_v25  ;;  %v833_v22 = vadd.f32 %v817_v4, %v1675_v34  ;;  %v1240_v15 = vpop.eup %1239 }
 0x26c   : > { %851 = vst [vmem:[%s1806_s28 + $0x58] sm:$0xff] %v835_v5 }
 0x26d   : > { %849 = vst [vmem:[%s1806_s28 + $0x48] sm:$0xff] %v833_v22 }
 0x273   : > { %v1069_v36 = vpop.f32.mrb[12].mxu1 }
 0x274   : > { %v802_v11 = vadd.f32 %v1069_v36, %v1792_v9  ;;  %v793_v33 = vpop.f32.mrb[13].mxu1 }
 0x275   : > { %v794_v20 = vadd.f32 %v1792_v9, %v793_v33  ;;  %v1070_v37 = vpop.f32.mrb[14].mxu1 }
 0x276   : > { %v822_v10 = vmul.f32 %v1234_v17, %v802_v11  ;;  %v805_v34 = vadd.f32 %v1070_v37, %v1792_v9  ;;  %v796_v3 = vpop.f32.mrb[15].mxu1 }
 0x277   : > { %v820_v6 = vmul.f32 %v1236_v7, %v794_v20  ;;  %v797_v13 = vadd.f32 %v1792_v9, %v796_v3 }
 0x278   : > { %v838_v16 = vadd.f32 %v822_v10, %v1699_v42  ;;  %v823_v14 = vmul.f32 %v1238_v12, %v805_v34 }
 0x279   : > { %v836_v19 = vadd.f32 %v820_v6, %v1690_v39  ;;  %v821_v23 = vmul.f32 %v1240_v15, %v797_v13 }
 0x27a   : > { %854 = vst [vmem:[%s1806_s28 + $0x70] sm:$0xff] %v838_v16  ;;  %v839_v38 = vadd.f32 %v823_v14, %v1702_v43 }
 0x27b   : > { %852 = vst [vmem:[%s1806_s28 + $0x60] sm:$0xff] %v836_v19  ;;  %v837_v42 = vadd.f32 %v821_v23, %v1693_v40 }
 0x27c   : > { %855 = vst [vmem:[%s1806_s28 + $0x78] sm:$0xff] %v839_v38 }
 0x27d   : > { %853 = vst [vmem:[%s1806_s28 + $0x68] sm:$0xff] %v837_v42 }
 0x27e   : > { %1340 = shalt.err (!%p1337_p1)
}
 0x27f   : > { %s1341_s14 = scalar_lea.hbm %s1859_s12, 2048  ;;  %s1345_s15 = scalar_lea.hbm %s1914_s5, 4096 }
 0x280   : > { %p1342_p13 = scmp.ne.s32.totalorder %s1859_s12, %s1341_s14  ;;  %p1346_p4 = scmp.lt.u32.totalorder %s1859_s12, %s1914_s5 }
 0x281   : > { %p1347_p7 = scmp.lt.u32.totalorder %s1345_s15, %s1341_s14  ;;  %p1349_p11 = scmp.lt.u32.totalorder %s1341_s14, %s1859_s12 }
 0x282   : > { %p1343_p6 = pnand %p1342_p13, %p1928_p0 }
 0x283   : > { %p1348_p8 = por %p1347_p7, %p1346_p4 }
 0x284   : > { %p1344_p10 = pneg %p1343_p6 }
 0x285   : > { %p1350_p2 = por %p1349_p11, %p1348_p8 }
 0x287   : > { %p1351_p3 = pnand %p1350_p2, %p1344_p10 }
 0x289   : > { %1354 = shalt.err (!%p1351_p3)
}
 0x28a   : > { %s1408_s13 = smov 128   ;;  %s1409_s11 = smov 8  }
 0x28b   : > { %1081 = dma.vmem_to_hbm [thread:$0]  (%p1928_p0), %s1861_s17, 2048, %s1859_s12, %s857_s22, %s1408_s13, %s1408_s13, %s1409_s11  }
 0x28c PF: > { %s885_s29 = sand.u32 1, %s1385_s18   ;;  %p1929_p5 = scmp.ne.s32.totalorder %s1919_s25, 0 }
 0x28d   : > { %p1930_p9 = scmp.ge.s32.totalorder %s1397_s21, 2  ;;  %s886_s30 = scalar_lea.sflag [#allocation4], %s885_s29 }
 0x28f   : > { %p1095_p12 = pnand %p1930_p9, %p1929_p5 }
 0x291   : > { %1380 = dma.done.wait (!%p1095_p12), %s886_s30, 2048  }
 0x292   : > { %1382 = vsyncadd (!%p1095_p12), %s886_s30, 4294965248  ;;  %p19_p1 = scmp.ge.s32.totalorder %s1553_s23, 4   ;;  %s1931_s18 = smov %s1389_s19 }
 0x293   : > { %s1932_s19 = smov %s1393_s20  ;;  %s1933_s20 = smov %s1562_s7 }
 0x294   : > { %s1934_s21 = smov %s1553_s23  ;;  %21 = sbr.rel (!%p19_p1) target bundleno = 6 (0x6), region = 93 }
 0x29b   :  { %891 = vsyncpa [#allocation3], 1 }
 0x29c   :  { %893 = vsyncpa [#allocation3 + $0x1], 1 }
 0x29d   :  { %894 = vsyncpa [#allocation6], 1 }
 0x29e   :  { %895 = vsyncpa [#allocation4], 1 }
 0x29f   :  { %897 = vsyncpa [#allocation4 + $0x1], 1 }

</bundles_post_ra>
